<compile_context>
chip_gen: v5e
topology: v5e:2x2
jax: 0.10.0
libtpu: 0.0.40
codegen_flags: <defaults>
</compile_context>

<pallas_src>
import jax
import jax.numpy as jnp
from jax import lax
from jax.experimental import pallas as pl
from jax.experimental.pallas import tpu as pltpu


# ---------------------------------------------------------------------------
# Pallas kernel: Bb batch elements per grid step, all capsules fused in N.
#   patch_ref : (Bb, Pp, Ka)  im2col'd input (+ trailing "valid" ones column)
#   w_ref     : (Ka, N)       fused weights with bias as last row  (resident)
#   g_ref     : (N, N)        capsule-group indicator, f32         (resident)
#   out_ref   : (Bb, Pp, N)   squashed conv output, lane-dense last dim
# ---------------------------------------------------------------------------
def primary_caps_kernel(patch_ref, w_ref, g_ref, out_ref):
    Bb, Pp, Ka = patch_ref.shape
    N = w_ref.shape[1]

    # (Bb, Pp, Ka) -> (Bb*Pp, Ka): Pp is a multiple of 8, so this merge does
    # not cross (8,128) tile boundaries (free re-tiling, no copy).
    patches = patch_ref[...].reshape(Bb * Pp, Ka)
    w = w_ref[...]
    g = g_ref[...]

    # Conv-as-matmul on the MXU, f32 accumulation.  The bias lives in the last
    # row of w and is picked up by the "valid" ones-column, so padded spatial
    # rows (valid == 0, patches == 0) come out exactly zero.
    u2 = jnp.dot(patches, w, preferred_element_type=jnp.float32)    # (Bb*Pp, N)
    u = u2.reshape(Bb, Pp, N)                                        # tile-aligned split

    # Per-(batch, capsule) squared norm: sublane reduce over spatial rows, then
    # spread each Cout-wide capsule group's sum across its own lanes with one
    # batched matmul against the group-indicator matrix (no lane reshapes, no
    # partial stores).
    col_sq = jnp.sum(u * u, axis=1)                                  # (Bb, N) f32
    sq = jnp.dot(col_sq, g, preferred_element_type=jnp.float32)      # (Bb, N) f32

    # squash scale: sq / ((1+sq)*sqrt(sq)) == sqrt(sq) / (1+sq); reciprocal on
    # the EUP slot, well-defined at sq == 0 (no NaN, unlike the literal formula).
    scale = jnp.sqrt(sq) * pl.reciprocal(1.0 + sq, approx=True)      # (Bb, N)

    # Lane-dense, fully (8,128)-aligned store.
    out_ref[...] = (u * scale[:, None, :]).astype(out_ref.dtype)


# ---------------------------------------------------------------------------
# Wrapper helpers
# ---------------------------------------------------------------------------
def _im2col_nchw(x, kh, kw, stride, dtype):
    """x: (B, Cin, H, W) -> patches (B, Ho*Wo, Cin*kh*kw), Cin-major K order.

    The compute-dtype cast is folded in here so it fuses with the im2col
    transpose instead of being a separate HBM pass.
    """
    B, Cin, H, W = x.shape
    Ho = (H - kh) // stride + 1
    Wo = (W - kw) // stride + 1
    cols = []
    for i in range(kh):
        for j in range(kw):
            cols.append(x[:, :, i:i + stride * Ho:stride, j:j + stride * Wo:stride])
    # (B, Cin, kh*kw, Ho, Wo) with kh*kw in row-major (i, j) order
    patches = jnp.stack(cols, axis=2)
    # -> (B, Ho, Wo, Cin, kh*kw) -> (B, P, K) with K flattened as (Cin, kh, kw)
    patches = patches.transpose(0, 3, 4, 1, 2)
    patches = patches.reshape(B, Ho * Wo, Cin * kh * kw)
    return patches.astype(dtype), Ho, Wo


def _choose_batch_block(B, Pp, target_rows=512):
    """Largest divisor of B with Bb*Pp <= target_rows, keeping >= 2 grid steps
    (v7x megacore) whenever B >= 2."""
    best = 1
    for bb in range(1, B + 1):
        if B % bb != 0:
            continue
        if B >= 2 and B // bb < 2:
            continue
        if bb * Pp <= target_rows:
            best = max(best, bb)
    return best


def primary_caps_forward(x, weights, biases, *, stride=2,
                         compute_dtype=jnp.bfloat16, batch_block=None):
    """x: (B, Cin, H, W) NCHW. weights: (NC, Cout, Cin, kh, kw). biases: (NC, Cout).

    compute_dtype: dtype of the MXU operands (default bf16; accumulation and
    the squash stay in f32).  Pass jnp.float32 for a full-precision path.
    """
    B, Cin, H, W = x.shape
    NC, Cout, _, kh, kw = weights.shape
    out_dtype = x.dtype

    patches, Ho, Wo = _im2col_nchw(x, kh, kw, stride, compute_dtype)  # (B, P, K)
    P = Ho * Wo
    K = Cin * kh * kw
    N = NC * Cout

    # Pad spatial rows up to a multiple of 8 -> every block (8,128)-aligned,
    # unmasked output stores, free (Bb,Pp,K)->(Bb*Pp,K) merge in the kernel.
    Pp = -(-P // 8) * 8
    if Pp != P:
        patches = jnp.pad(patches, ((0, 0), (0, Pp - P), (0, 0)))

    # Append the "valid" ones column (0 on padded rows) and fold the bias into
    # an extra weight row:  u = [patches, valid] @ [[W], [bias]].
    valid = (jnp.arange(Pp) < P).astype(compute_dtype)                # (Pp,)
    valid = jnp.broadcast_to(valid[None, :, None], (B, Pp, 1))
    patches = jnp.concatenate([patches, valid], axis=-1)              # (B, Pp, K+1)
    Ka = K + 1

    # Fused weights: (NC, Cout, K) -> (K, NC, Cout) -> (K, N); lane j = nc*Cout+co.
    # K ordering (Cin, kh, kw) matches both the im2col and PyTorch's OIHW flatten.
    w_fused = weights.reshape(NC, Cout, K).transpose(2, 0, 1).reshape(K, N)
    w_aug = jnp.concatenate([w_fused, biases.reshape(1, N)], axis=0)   # (K+1, N)
    w_aug = w_aug.astype(compute_dtype)

    # Capsule-group indicator: g[i, j] = 1 iff lanes i, j share a capsule.
    # Kept f32 (only N*N*4 bytes resident) so the norm-spread matmul stays
    # full precision.
    cap_id = jnp.arange(N, dtype=jnp.int32) // Cout
    g = (cap_id[:, None] == cap_id[None, :]).astype(jnp.float32)       # (N, N)

    # Batch several images per grid step; keep >= 2 grid steps for megacore.
    Bb = _choose_batch_block(B, Pp) if batch_block is None else batch_block
    assert B % Bb == 0, (B, Bb)

    # VMEM budget from the actual buffers (double-buffered streamed blocks +
    # resident weights/group matrix), with headroom; capped under v7x's 64 MiB.
    in_sz = jnp.dtype(compute_dtype).itemsize
    out_sz = jnp.dtype(out_dtype).itemsize
    vmem_bytes = (2 * Bb * Pp * Ka * in_sz       # double-buffered patch blocks
                  + 2 * Bb * Pp * N * out_sz     # double-buffered output blocks
                  + Ka * N * in_sz               # resident weights (+bias row)
                  + N * N * 4)                   # resident group matrix (f32)
    vmem_limit = int(min(48 * 1024 * 1024, max(16 * 1024 * 1024, 2 * vmem_bytes)))

    out = pl.pallas_call(
        primary_caps_kernel,
        out_shape=jax.ShapeDtypeStruct((B, Pp, N), out_dtype),
        grid=(B // Bb,),
        in_specs=[
            pl.BlockSpec((Bb, Pp, Ka), lambda b: (b, 0, 0)),  # streamed per step
            pl.BlockSpec((Ka, N), lambda b: (0, 0)),          # weights: resident
            pl.BlockSpec((N, N), lambda b: (0, 0)),           # group mat: resident
        ],
        out_specs=pl.BlockSpec((Bb, Pp, N), lambda b: (b, 0, 0)),
        compiler_params=pltpu.CompilerParams(
            dimension_semantics=("parallel",),   # megacore split across grid steps
            vmem_limit_bytes=vmem_limit,
        ),
    )(patches, w_aug, g)

    # Slice off row padding, then pure layout glue (values unchanged): kernel
    # emits spatial-major (B, P, NC*Cout); the PyTorch view is channel-major
    # (B, NC, Cout*P).
    # TODO(synk): push this relayout into the consumer kernel's BlockSpec.
    out = out[:, :P, :]
    out = out.reshape(B, P, NC, Cout).transpose(0, 2, 3, 1).reshape(B, NC, Cout * P)
    return out


# ---------------------------------------------------------------------------
# Pure-JAX reference (lax.conv) for the correctness check.
# ---------------------------------------------------------------------------
def primary_caps_reference(x, weights, biases, *, stride=2):
    B = x.shape[0]
    NC = weights.shape[0]
    us = []
    for c in range(NC):
        y = lax.conv_general_dilated(
            x, weights[c], window_strides=(stride, stride), padding="VALID",
            dimension_numbers=("NCHW", "OIHW", "NCHW"))
        y = y + biases[c][None, :, None, None]
        us.append(y)
    u = jnp.stack(us, axis=1).reshape(B, NC, -1)
    sq = jnp.sum(u * u, axis=2, keepdims=True)
    return sq * u / ((1.0 + sq) * jnp.sqrt(sq))


if __name__ == "__main__":
    # Small shapes consistent with the module (scaled down from in_channels=32,
    # out_channels=8, kernel=9, stride=2); chosen so NC*Cout = 128 (lane-dense)
    # and B=4 -> 2 grid steps of 2 batch elements each.
    B, Cin, H, W = 4, 8, 16, 16
    num_capsules, Cout, ksz, stride = 8, 16, 3, 2

    key = jax.random.PRNGKey(0)
    kx, kw_, kb = jax.random.split(key, 3)
    x = jax.random.normal(kx, (B, Cin, H, W), dtype=jnp.float32)
    weights = 0.1 * jax.random.normal(
        kw_, (num_capsules, Cout, Cin, ksz, ksz), dtype=jnp.float32)
    biases = 0.1 * jax.random.normal(kb, (num_capsules, Cout), dtype=jnp.float32)

    ref = primary_caps_reference(x, weights, biases, stride=stride)

    # Default path: bf16 MXU operands, f32 accumulation + f32 squash.
    out_bf16 = jax.block_until_ready(
        primary_caps_forward(x, weights, biases, stride=stride))
    assert out_bf16.shape == ref.shape, (out_bf16.shape, ref.shape)
    assert jnp.allclose(out_bf16, ref, atol=2e-2, rtol=5e-2), "bf16 mismatch vs reference"

    # Full f32 path (tolerance covers the EUP approximate reciprocal in squash).
    out_f32 = jax.block_until_ready(
        primary_caps_forward(x, weights, biases, stride=stride,
                             compute_dtype=jnp.float32))
    assert out_f32.shape == ref.shape, (out_f32.shape, ref.shape)
    assert jnp.allclose(out_f32, ref, atol=1e-3, rtol=1e-2), "f32 mismatch vs reference"

    print("KERNEL_OK")
</pallas_src>

<mosaic_0001>
module attributes {stable_mosaic.version = 11 : i64} {
  func.func @primary_caps_kernel(%arg0: i32, %arg1: memref<2x56x73xbf16, #tpu.memory_space<vmem>>, %arg2: memref<73x128xbf16, #tpu.memory_space<vmem>>, %arg3: memref<128x128xf32, #tpu.memory_space<vmem>>, %arg4: memref<2x56x128xf32, #tpu.memory_space<vmem>>) attributes {dimension_semantics = [#tpu.dimension_semantics<parallel>], iteration_bounds = array<i64: 2>, scalar_prefetch = 0 : i64, scratch_operands = 0 : i64, tpu.core_type = #tpu.core_type<tc>, window_params = [{transform_indices = @transform_0, window_bounds = array<i64: 2, 56, 73>}, {pipeline_mode = #tpu.pipeline_mode<synchronous>, transform_indices = @transform_1, window_bounds = array<i64: 73, 128>}, {pipeline_mode = #tpu.pipeline_mode<synchronous>, transform_indices = @transform_2, window_bounds = array<i64: 128, 128>}, {transform_indices = @transform_3, window_bounds = array<i64: 2, 56, 128>}]} {
    %c0 = arith.constant 0 : index
    %c0_0 = arith.constant 0 : index
    %c0_1 = arith.constant 0 : index
    %0 = vector.load %arg1[%c0, %c0_0, %c0_1] : memref<2x56x73xbf16, #tpu.memory_space<vmem>>, vector<2x56x73xbf16>
    %1 = vector.shape_cast %0 : vector<2x56x73xbf16> to vector<112x73xbf16>
    %c0_2 = arith.constant 0 : index
    %c0_3 = arith.constant 0 : index
    %2 = vector.load %arg2[%c0_2, %c0_3] : memref<73x128xbf16, #tpu.memory_space<vmem>>, vector<73x128xbf16>
    %c0_4 = arith.constant 0 : index
    %c0_5 = arith.constant 0 : index
    %3 = vector.load %arg3[%c0_4, %c0_5] : memref<128x128xf32, #tpu.memory_space<vmem>>, vector<128x128xf32>
    %cst = arith.constant dense<0.000000e+00> : vector<112x128xf32>
    %4 = tpu.matmul %1, %2, %cst {dimension_numbers = #tpu.dot_dimension_numbers<[1], [0], [0], [1], [0, 0, 1, 1], [], []>} : vector<112x73xbf16>, vector<73x128xbf16>, vector<112x128xf32> -> vector<112x128xf32>
    %5 = vector.shape_cast %4 : vector<112x128xf32> to vector<2x56x128xf32>
    %6 = arith.mulf %5, %5 : vector<2x56x128xf32>
    %cst_6 = arith.constant dense<0.000000e+00> : vector<2x128xf32>
    %7 = vector.multi_reduction <add>, %6, %cst_6 [1] : vector<2x56x128xf32> to vector<2x128xf32>
    %cst_7 = arith.constant dense<0.000000e+00> : vector<2x128xf32>
    %8 = tpu.matmul %7, %3, %cst_7 {dimension_numbers = #tpu.dot_dimension_numbers<[1], [0], [0], [1], [0, 0, 1, 1], [], []>} : vector<2x128xf32>, vector<128x128xf32>, vector<2x128xf32> -> vector<2x128xf32>
    %9 = math.sqrt %8 : vector<2x128xf32>
    %cst_8 = arith.constant 1.000000e+00 : f32
    %10 = vector.broadcast %cst_8 : f32 to vector<2x128xf32>
    %11 = arith.addf %10, %8 : vector<2x128xf32>
    %12 = tpu.reciprocal %11 {approx = true} : vector<2x128xf32> -> vector<2x128xf32>
    %13 = arith.mulf %9, %12 : vector<2x128xf32>
    %14 = vector.shape_cast %13 : vector<2x128xf32> to vector<2x1x128xf32>
    %15 = vector.broadcast %14 : vector<2x1x128xf32> to vector<2x56x128xf32>
    %16 = arith.mulf %5, %15 : vector<2x56x128xf32>
    %c0_9 = arith.constant 0 : index
    %c0_10 = arith.constant 0 : index
    %c0_11 = arith.constant 0 : index
    %17 = vector.load %arg4[%c0_9, %c0_10, %c0_11] : memref<2x56x128xf32, #tpu.memory_space<vmem>>, vector<2x56x128xf32>
    tpu.vector_store %arg4[%c0_9, %c0_10, %c0_11], %16 {strides = array<i32>} : memref<2x56x128xf32, #tpu.memory_space<vmem>>, vector<2x56x128xf32>,
    return
  }
  func.func @transform_0(%arg0: i32) -> (i32, i32, i32) {
    %c0_i32 = arith.constant 0 : i32
    %c0_i32_0 = arith.constant 0 : i32
    %c0_i32_1 = arith.constant 0 : i32
    return %arg0, %c0_i32, %c0_i32_0 : i32, i32, i32
  }
  func.func @transform_1(%arg0: i32) -> (i32, i32) {
    %c0_i32 = arith.constant 0 : i32
    %c0_i32_0 = arith.constant 0 : i32
    %c0_i32_1 = arith.constant 0 : i32
    return %c0_i32, %c0_i32_0 : i32, i32
  }
  func.func @transform_2(%arg0: i32) -> (i32, i32) {
    %c0_i32 = arith.constant 0 : i32
    %c0_i32_0 = arith.constant 0 : i32
    %c0_i32_1 = arith.constant 0 : i32
    return %c0_i32, %c0_i32_0 : i32, i32
  }
  func.func @transform_3(%arg0: i32) -> (i32, i32, i32) {
    %c0_i32 = arith.constant 0 : i32
    %c0_i32_0 = arith.constant 0 : i32
    %c0_i32_1 = arith.constant 0 : i32
    return %arg0, %c0_i32, %c0_i32_0 : i32, i32, i32
  }
}

</mosaic_0001>

<bundles_post_ra>
// kernel: tpu_custom_call.1
= control target key start
LH: loop header
LB: loop body
LE: loop exit
PB: predicated region body
PF: predicated region fallthrough
CT: control target
= control target key end

     0   :  { %8 = vsyncpa [#allocation3], 0  ;;  %s1225_s0 = inlined_call_operand.hbm [shape: bf16[4,56,73], index: 0, kind: input, shape index: {}]   ;;  %s1226_s1 = inlined_call_operand.hbm [shape: bf16[73,128], index: 1, kind: input, shape index: {}]   ;;  %s1227_s2 = inlined_call_operand.hbm [shape: f32[128,128], index: 2, kind: input, shape index: {}]   ;;  %s1228_s3 = inlined_call_operand.hbm [shape: f32[4,56,128], index: 3, kind: output, shape index: {}]  }
   0x1   :  { %10 = vsyncpa [#allocation3 + $0x1], 0 }
   0x2   :  { %11 = vsyncpa [#allocation6], 0 }
   0x3   :  { %12 = vsyncpa [#allocation4], 0 }
   0x4   :  { %14 = vsyncpa [#allocation4 + $0x1], 0  ;;  %s998_s12 = smov 0   ;;  %s1000_s13 = smov 0  }
   0x5   :  { %s1002_s14 = smov 0   ;;  %s1004_s15 = smov 0  }
   0x6 LB: > { %s1019_s16 = sadd.s32 4294967295, %s967_s15   ;;  %s626_s17 = sadd.s32 4294967294, %s967_s15   ;;  %s967_s15 = sphi %s1004_s15, %s1240_s15   ;;  %s963_s14 = sphi %s1002_s14, %s1239_s14   ;;  %s959_s13 = sphi %s1000_s13, %s1238_s13   ;;  %s955_s12 = sphi %s998_s12, %s1237_s12  }
   0x7   : > { %p40_p0 = scmp.ne.s32.totalorder %s959_s13, %s955_s12  ;;  %p41_p1 = scmp.eq.s32.totalorder %s1019_s16, 0 }
   0x8   : > { %p106_p2 = scmp.eq.s32.totalorder %s1019_s16, 1  ;;  %p112_p3 = scmp.eq.s32.totalorder %s626_s17, 1 }
   0x9   : > { %p1028_p4 = por %p41_p1, %p40_p0  ;;  %p627_p5 = scmp.ge.s32.totalorder %s967_s15, 1 }
   0xa   : > { %p1033_p6 = por %p112_p3, %p40_p0  ;;  %p119_p7 = scmp.lt.s32.totalorder %s967_s15, 3 }
   0xb   : > { %s130_s22 = sshll.u32 %s1226_s1, 4  ;;  %s969_s24 = smov [#allocation5]   ;;  %s131_s22 = int_to_ptr.hbm [resolvable:$true] %s130_s22 }
   0xc   : > { %p1041_p8 = pnand %p627_p5, %p119_p7  ;;  %s132_s25 = sshll.u32 %s969_s24, 4  ;;  %s133_s25 = int_to_ptr.vmem [resolvable:$true] %s132_s25 }
   0xd   : > { %s144_s28 = sshll.u32 %s1227_s2, 4  ;;  %s1229_s29 = smov 64   ;;  %s145_s28 = int_to_ptr.hbm [resolvable:$true] %s144_s28 }
   0xe   : > { %p741_p9 = pneg %p1041_p8  ;;  %s971_s30 = smov 4  }
   0xf   : > { %s972_s4 = smov [#allocation7]   ;;  %s973_s6 = smov 128  }
  0x10   : > { %p742_p10 = pnand %p741_p9, %p41_p1  ;;  %s146_s5 = sshll.u32 %s972_s4, 4  ;;  %s147_s5 = int_to_ptr.vmem [resolvable:$true] %s146_s5 }
  0x11   : > { %s974_s7 = smov 8   ;;  %s1057_s8 = sadd.s32 1, %s967_s15  }
  0x12   : > { %744 = dma.hbm_to_vmem [thread:$0]  (!%p742_p10), %s131_s22, 640, %s133_s25, [#allocation6], %s1229_s29, %s1229_s29, %s971_s30  }
  0x13   : > { %747 = dma.hbm_to_vmem [thread:$0]  (!%p742_p10), %s145_s28, 2048, %s147_s5, [#allocation6], %s973_s6, %s973_s6, %s974_s7  }
  0x14   : > { %s24_s9 = ssub.s32 %s967_s15, %s1057_s8  ;;  %s27_s10 = sadd.s32 1, %s963_s14 }
  0x15   : > { %p25_p12 = scmp.eq.s32.totalorder %s24_s9, 0  ;;  %p34_p13 = scmp.ne.s32.totalorder %s963_s14, %s959_s13 }
  0x16   : > { %p35_p0 = scmp.eq.s32.totalorder %s967_s15, 0  ;;  %p758_p7 = scmp.lt.s32.totalorder %s967_s15, 2 }
  0x17   : > { %s1066_s11 = scalar_select %p25_p12, %s963_s14, %s27_s10  }
  0x18   : > { %p36_p3 = por %p35_p0, %p34_p13  ;;  %p1070_p5 = por %p106_p2, %p34_p13 }
  0x19   : > { %s160_s20 = sand.u32 1, %s963_s14   ;;  %s725_s22 = smul.u32 56, %s967_s15 }
  0x1a   : > { %s724_s21 = smul.u32 56, %s160_s20  ;;  %p1077_p9 = pnand %p758_p7, %p36_p3 }
  0x1b   : > { %s170_s27 = scalar_lea.hbm %s1225_s0, %s725_s22  ;;  %s161_s6 = scalar_lea.sflag [#allocation3], %s160_s20 }
  0x1c   : > { %s164_s28 = scalar_lea.vmem [#allocation2], %s724_s21  ;;  %s171_s5 = sshll.u32 %s170_s27, 4  ;;  %s172_s5 = int_to_ptr.hbm [resolvable:$true] %s171_s5 }
  0x1d   : > { %s173_s4 = sshll.u32 %s164_s28, 4  ;;  %s867_s7 = sshra.s32 %s172_s5, 4  ;;  %s174_s4 = int_to_ptr.vmem [resolvable:$true] %s173_s4  ;;  %s868_s7 = int_to_ptr.hbm [resolvable:$true] %s867_s7 }
  0x1e   : > { %s869_s9 = scalar_lea.hbm %s868_s7, 56  ;;  %p871_p10 = pneg %p1077_p9 }
  0x1f   : > { %p870_p2 = scmp.ne.s32.totalorder %s868_s7, %s869_s9  ;;  %s874_s25 = scalar_lea.hbm %s1225_s0, 112 }
  0x20   : > { %p875_p0 = scmp.lt.s32.totalorder %s868_s7, %s1225_s0  ;;  %p876_p3 = scmp.lt.s32.totalorder %s874_s25, %s869_s9 }
  0x21   : > { %p872_p12 = pnand %p871_p10, %p870_p2 }
  0x22   : > { %p877_p7 = por %p876_p3, %p875_p0 }
  0x23   : > { %p873_p13 = pneg %p872_p12 }
  0x25   : > { %p878_p11 = pnand %p877_p7, %p873_p13 }
  0x27   : > { %881 = shalt.err (!%p878_p11)
}
  0x28   : > { %s1235_s20 = smov 64   ;;  %185 = sbr.rel (%p1041_p8) target bundleno = 421 (0x1a5), region = 32 }
  0x29   : > { %751 = dma.hbm_to_vmem [thread:$0]  (!%p1077_p9), %s172_s5, 896, %s174_s4, %s161_s6, %s1235_s20, %s1235_s20, %s971_s30  }
  0x2a   : > { %s1100_s29 = sand.u32 (!%p1041_p8), 1, %s959_s13  }
  0x2b   : > { %s726_s21 = smul.u32 (!%p1041_p8), 56, %s1100_s29  ;;  %s188_s27 = scalar_lea.sflag (!%p1041_p8), [#allocation3], %s1100_s29 }
  0x2d   : > { %s1104_s28 = scalar_lea.vmem [#allocation2], %s726_s21 }
  0x2e   : > { %942 = dma.done.wait (%p1028_p4), %s188_s27, 896  }
  0x2f   : > { %944 = vsyncadd (%p1028_p4), %s188_s27, 4294966400 }
  0x30   : > { %946 = dma.done.wait (%p41_p1), [#allocation6], 2688  }
  0x31   : > { %948 = vsyncadd (%p41_p1), [#allocation6], 4294964608  ;;  %vm354_vm0 = vcmask 1043456   ;;  %vm355_vm1 = vcmask 1044480   ;;  %v975_v0 = vmov 65535   ;;  %v707_v7 = vld [vmem:[#allocation5 + $0x18] sm:$0xff] }
  0x32   : > { %v356_v1 = vsel %vm354_vm0, 4294967295, %v975_v0  ;;  %v683_v2 = vld [vmem:[#allocation5 + $0x20] sm:$0xf]  ;;  %v708_v3 = vld [vmem:[#allocation5 + $0x20] sm:$0x10]  ;;  %v706_v8 = vld [vmem:[#allocation5 + $0x10] sm:$0xff] }
  0x33   : > { %v357_v4 = vsel %vm355_vm1, %v356_v1, 0  ;;  %v684_v5 = vor.u32 %v708_v3, %v683_v2  ;;  %v705_v9 = vld [vmem:[#allocation5 + $0x8] sm:$0xff]  ;;  %v704_v10 = vld [vmem:[#allocation5] sm:$0xff]  ;;  %vm332_vm2 = vcmask 596992   ;;  %v702_v13 = vld [vmem:[%s1104_s28 + $0x28] sm:$0xff]  ;;  %vm445_vm3 = vcmask 1041409  }
  0x34   : > { %v697_v11 = vld [vmem:[%s1104_s28] sm:$0xff]  ;;  %v699_v12 = vld [vmem:[%s1104_s28 + $0x10] sm:$0xff]  ;;  %v698_v15 = vld [vmem:[%s1104_s28 + $0x8] sm:$0xff]  ;;  %s727_s18 = smul.u32 112, %s1100_s29  ;;  %s518_s7 = scalar_lea.sflag [#allocation4], %s1100_s29 }
  0x35   : > { %v359_v6 = vand.u32 %v684_v5, %v357_v4  ;;  %v701_v14 = vld [vmem:[%s1104_s28 + $0x20] sm:$0xff]  ;;  %v700_v16 = vld [vmem:[%s1104_s28 + $0x18] sm:$0xff]  ;;  %v703_v17 = vld [vmem:[%s1104_s28 + $0x30] sm:$0xff]  ;;  %s728_s30 = smul.u32 112, %s1019_s16  ;;  %s917_s22 = scalar_lea.hbm %s1228_s3, 224 }
  0x36   : > { %v267_v18 = vld [vmem:[#allocation7 + $0x78] sm:$0xff]  ;;  %v266_v19 = vld [vmem:[#allocation7 + $0x70] sm:$0xff]  ;;  %v265_v20 = vld [vmem:[#allocation7 + $0x68] sm:$0xff]  ;;  %s224_s23 = scalar_lea.vmem [#allocation8], %s727_s18 }
  0x37   : > { %364 = vmatpush.bf16.msra.mxu0 %v359_v6  ;;  %709 = vmatpush.bf16.msra.mxu1 %v359_v6  ;;  %v264_v21 = vld [vmem:[#allocation7 + $0x60] sm:$0xff]  ;;  %v263_v22 = vld [vmem:[#allocation7 + $0x58] sm:$0xff]  ;;  %v262_v23 = vld [vmem:[#allocation7 + $0x50] sm:$0xff]  ;;  %s530_s5 = scalar_lea.hbm %s1228_s3, %s728_s30  ;;  %s531_s16 = sshll.u32 %s224_s23, 4  ;;  %s532_s16 = int_to_ptr.vmem [resolvable:$true] %s531_s16 }
  0x38   : > { %711 = vmatpush.bf16.msra.mxu3 %v359_v6  ;;  %710 = vmatpush.bf16.msra.mxu2 %v359_v6  ;;  %v261_v26 = vld [vmem:[#allocation7 + $0x48] sm:$0xff]  ;;  %v260_v27 = vld [vmem:[#allocation7 + $0x40] sm:$0xff]  ;;  %v259_v28 = vld [vmem:[#allocation7 + $0x38] sm:$0xff]  ;;  %s533_s6 = sshll.u32 %s530_s5, 4  ;;  %s534_s6 = int_to_ptr.hbm [resolvable:$true] %s533_s6 }
  0x39   : > { %v258_v30 = vld [vmem:[#allocation7 + $0x30] sm:$0xff]  ;;  %v257_v33 = vld [vmem:[#allocation7 + $0x28] sm:$0xff]  ;;  %v256_v34 = vld [vmem:[#allocation7 + $0x20] sm:$0xff]  ;;  %s911_s9 = sshra.s32 %s534_s6, 4  ;;  %s912_s9 = int_to_ptr.hbm [resolvable:$true] %s911_s9 }
  0x3a   : > { %v255_v36 = vld [vmem:[#allocation7 + $0x18] sm:$0xff]  ;;  %v254_v37 = vld [vmem:[#allocation7 + $0x10] sm:$0xff]  ;;  %v253_v39 = vld [vmem:[#allocation7 + $0x8] sm:$0xff]  ;;  %s913_s10 = scalar_lea.hbm %s912_s9, 112  ;;  %p918_p11 = scmp.lt.s32.totalorder %s912_s9, %s1228_s3 }
  0x3b   : > { %365 = vmatpush.bf16.msra.mxu0 %v707_v7  ;;  %712 = vmatpush.bf16.msra.mxu1 %v707_v7  ;;  %v252_v42 = vld [vmem:[#allocation7] sm:$0xff]  ;;  %p914_p1 = scmp.ne.s32.totalorder %s912_s9, %s913_s10  ;;  %p919_p9 = scmp.lt.s32.totalorder %s917_s22, %s913_s10 }
  0x3c   : > { %714 = vmatpush.bf16.msra.mxu3 %v707_v7  ;;  %713 = vmatpush.bf16.msra.mxu2 %v707_v7 }
  0x3d   : > { %p915_p4 = pnand %p914_p1, %p1070_p5  ;;  %p920_p2 = por %p919_p9, %p918_p11 }
  0x3f   : > { %366 = vmatpush.bf16.msra.mxu0 %v706_v8  ;;  %715 = vmatpush.bf16.msra.mxu1 %v706_v8  ;;  %p916_p8 = pneg %p915_p4 }
  0x40   : > { %717 = vmatpush.bf16.msra.mxu3 %v706_v8  ;;  %716 = vmatpush.bf16.msra.mxu2 %v706_v8 }
  0x41   : > { %p921_p10 = pnand %p920_p2, %p916_p8 }
  0x43   : > { %367 = vmatpush.bf16.msra.mxu0 %v705_v9  ;;  %718 = vmatpush.bf16.msra.mxu1 %v705_v9 }
  0x44   : > { %720 = vmatpush.bf16.msra.mxu3 %v705_v9  ;;  %719 = vmatpush.bf16.msra.mxu2 %v705_v9 }
  0x47   : > { %368 = vmatpush.bf16.msra.mxu0 %v704_v10  ;;  %721 = vmatpush.bf16.msra.mxu1 %v704_v10 }
  0x48   : > { %723 = vmatpush.bf16.msra.mxu3 %v704_v10  ;;  %722 = vmatpush.bf16.msra.mxu2 %v704_v10 }
  0x4a   : > { %685 = vmatmul.msk.bf16.vlgmr.msra.gmra.mxu0 %vm332_vm2, %v697_v11  ;;  %687 = vmatmul.msk.bf16.vlgmr.msra.gmra.mxu1 %vm332_vm2, %v699_v12 }
  0x4b   : > { %690 = vmatmul.msk.bf16.vlgmr.msra.gmra.mxu3 %vm332_vm2, %v702_v13  ;;  %689 = vmatmul.msk.bf16.vlgmr.msra.gmra.mxu2 %vm332_vm2, %v701_v14 }
  0x4c   : > { %448 = vmatpush.msrb.mxu1 %v267_v18 }
  0x4e   : > { %449 = vmatpush.msrb.mxu1 %v266_v19 }
  0x50   : > { %450 = vmatpush.msrb.mxu1 %v265_v20 }
  0x52   : > { %451 = vmatpush.msrb.mxu1 %v264_v21 }
  0x54   : > { %452 = vmatpush.msrb.mxu1 %v263_v22 }
  0x56   : > { %453 = vmatpush.msrb.mxu1 %v262_v23 }
  0x58   : > { %454 = vmatpush.msrb.mxu1 %v261_v26 }
  0x5a   : > { %686 = vmatmul.msk.bf16.gmra.mxu0 %vm332_vm2, %v698_v15  ;;  %688 = vmatmul.msk.bf16.gmra.mxu1 %vm332_vm2, %v700_v16 }
  0x5b   : > { %691 = vmatmul.msk.bf16.gmra.mxu3 %vm332_vm2, %v703_v17  ;;  %455 = vmatpush.msrb.mxu1 %v260_v27 }
  0x5d   : > { %456 = vmatpush.msrb.mxu1 %v259_v28 }
  0x5f   : > { %457 = vmatpush.msrb.mxu1 %v258_v30 }
  0x61   : > { %458 = vmatpush.msrb.mxu1 %v257_v33 }
  0x63   : > { %459 = vmatpush.msrb.mxu1 %v256_v34 }
  0x65   : > { %460 = vmatpush.msrb.mxu1 %v255_v36 }
  0x67   : > { %461 = vmatpush.msrb.mxu1 %v254_v37 }
  0x69   : > { %462 = vmatpush.msrb.mxu1 %v253_v39 }
  0x6b   : > { %463 = vmatpush.msrb.mxu1 %v252_v42 }
  0xc7   : > { %v1121_v24 = vpop.f32.mrf.mxu0  ;;  %v1123_v25 = vpop.f32.mrf.mxu1 }
  0xc8   : > { %v405_v44 = vmul.f32 %v1121_v24, %v1121_v24  ;;  %v409_v55 = vmul.f32 %v1123_v25, %v1123_v25 }
  0xce   : > { %v1125_v29 = vpop.f32.mrf.mxu3  ;;  %v1131_v35 = vpop.f32.mrf.mxu2 }
  0xcf   : > { %v1127_v31 = vpop.f32.mrf.mxu0  ;;  %v1129_v32 = vpop.f32.mrf.mxu1  ;;  %v413_v51 = vmul.f32 %v1131_v35, %v1131_v35  ;;  %v415_v59 = vmul.f32 %v1125_v29, %v1125_v29 }
  0xd0   : > { %v406_v43 = vmul.f32 %v1127_v31, %v1127_v31  ;;  %v410_v60 = vmul.f32 %v1129_v32, %v1129_v32 }
  0xd2   : > { %v419_v46 = vadd.f32 %v406_v43, %v405_v44 }
  0xd6   : > { %v1133_v38 = vpop.f32.mrf.mxu3  ;;  %v1145_v47 = vpop.f32.mrf.mxu2 }
  0xd7   : > { %v1135_v40 = vpop.f32.mrf.mxu0  ;;  %v1137_v41 = vpop.f32.mrf.mxu1  ;;  %v414_v56 = vmul.f32 %v1145_v47, %v1145_v47  ;;  %v416_v63 = vmul.f32 %v1133_v38, %v1133_v38 }
  0xd8   : > { %v407_v45 = vmul.f32 %v1135_v40, %v1135_v40  ;;  %v411_v0 = vmul.f32 %v1137_v41, %v1137_v41 }
  0xda   : > { %v420_v52 = vadd.f32 %v419_v46, %v407_v45 }
  0xde   : > { %v1147_v48 = vpop.f32.mrf.mxu3 }
  0xdf   : > { %v1149_v49 = vpop.f32.mrf.mxu0  ;;  %v1151_v50 = vpop.f32.mrf.mxu1  ;;  %v417_v4 = vmul.f32 %v1147_v48, %v1147_v48 }
  0xe0   : > { %v408_v53 = vmul.f32 %v1149_v49, %v1149_v49  ;;  %v412_v54 = vmul.f32 %v1151_v50, %v1151_v50 }
  0xe2   : > { %v421_v57 = vadd.f32 %v420_v52, %v408_v53  ;;  %v431_v58 = vadd.f32 %v413_v51, %v412_v54 }
  0xe4   : > { %v422_v61 = vadd.f32 %v421_v57, %v409_v55  ;;  %v432_v62 = vadd.f32 %v431_v58, %v414_v56 }
  0xe6   : > { %v423_v1 = vadd.f32 %v422_v61, %v410_v60  ;;  %v433_v2 = vadd.f32 %v432_v62, %v415_v59  ;;  %v1171_v3 = vpop.f32.mrf.mxu3 }
  0xe7   : > { %v418_v8 = vmul.f32 %v1171_v3, %v1171_v3 }
  0xe8   : > { %v424_v5 = vadd.f32 %v423_v1, %v411_v0  ;;  %v434_v6 = vadd.f32 %v433_v2, %v416_v63 }
  0xea   : > { %v425_v7 = vrot.slane %v424_v5, 4  ;;  %v435_v9 = vadd.f32 %v434_v6, %v417_v4 }
  0xec   : > { %v436_v10 = vadd.f32 %v435_v9, %v418_v8  ;;  %v426_v11 = vadd.f32 %v425_v7, %v424_v5 }
  0xee   : > { %v437_v12 = vrot.slane %v436_v10, 4  ;;  %v427_v13 = vrot.slane %v426_v11, 2 }
  0xf0   : > { %v438_v14 = vadd.f32 %v437_v12, %v436_v10  ;;  %v428_v15 = vadd.f32 %v427_v13, %v426_v11 }
  0xf2   : > { %v439_v16 = vrot.slane %v438_v14, 2  ;;  %v429_v18 = vrot.slane %v428_v15, 1 }
  0xf4   : > { %v440_v17 = vadd.f32 %v439_v16, %v438_v14  ;;  %v430_v20 = vadd.f32 %v429_v18, %v428_v15 }
  0xf6   : > { %v441_v19 = vrot.slane %v440_v17, 1 }
  0xf8   : > { %v442_v21 = vadd.f32 %v441_v19, %v440_v17 }
  0xfa   : > { %v446_v22 = vsel %vm445_vm3, %v442_v21, %v430_v20 }
  0xfb   : > { %464 = vmatmul.f32.vlgmr.msrb.gmra.mxu1 %v446_v22 }
 0x178   : > { %v465_v23 = vpop.f32.mrf.mxu1 }
 0x179   : > { %803 = vrsqrt.f32 %v465_v23  ;;  %v480_v30 = vadd.f32 1.0, %v465_v23  ;;  %vm475_vm4 = vcmp.eq.f32.partialorder %v465_v23, inf  ;;  %v478_v39 = vand.u32 2147483648, %v465_v23 }
 0x17a   : > { %vm477_vm5 = vcmp.eq.f32.partialorder %v465_v23, 0.0 }
 0x17b   : > { %805 = vrcp.f32 %v480_v30 }
 0x17f   : > { %v804_v26 = vpop.eup %803 }
 0x180   : > { %v469_v27 = vmul.f32 %v804_v26, %v465_v23 }
 0x181   : > { %v806_v43 = vpop.eup %805 }
 0x182   : > { %v470_v28 = vmul.f32 %v804_v26, %v469_v27 }
 0x184   : > { %v471_v33 = vmul.f32 0.5, %v470_v28 }
 0x186   : > { %v472_v34 = vsub.f32 1.5, %v471_v33 }
 0x188   : > { %v473_v36 = vmul.f32 %v804_v26, %v472_v34 }
 0x18a   : > { %v474_v37 = vmul.f32 %v473_v36, %v465_v23 }
 0x18c   : > { %v476_v42 = vsel %vm475_vm4, %v465_v23, %v474_v37 }
 0x18d   : > { %v479_v44 = vsel %vm477_vm5, %v478_v39, %v476_v42 }
 0x18e   : > { %v482_v45 = vmul.f32 %v806_v43, %v479_v44 }
 0x190   : > { %v484_v46 = vrot.slane %v482_v45, 1  ;;  %v485_v51 = vperm.slane %v482_v45, 0 }
 0x192   : > { %v489_v52 = vmul.f32 %v485_v51, %v1121_v24  ;;  %v490_v53 = vmul.f32 %v485_v51, %v1127_v31  ;;  %v491_v54 = vmul.f32 %v485_v51, %v1135_v40  ;;  %v486_v55 = vperm.slane %v484_v46, 0 }
 0x193   : > { %v492_v56 = vmul.f32 %v485_v51, %v1149_v49  ;;  %v493_v57 = vmul.f32 %v485_v51, %v1123_v25  ;;  %v494_v58 = vmul.f32 %v485_v51, %v1129_v32  ;;  %v495_v59 = vmul.f32 %v485_v51, %v1137_v41 }
 0x194   : > { %503 = vst [vmem:[%s224_s23] sm:$0xff] %v489_v52  ;;  %v496_v24 = vmul.f32 %v486_v55, %v1151_v50  ;;  %v497_v31 = vmul.f32 %v486_v55, %v1131_v35  ;;  %v498_v25 = vmul.f32 %v486_v55, %v1145_v47  ;;  %v499_v40 = vmul.f32 %v486_v55, %v1125_v29 }
 0x195   : > { %504 = vst [vmem:[%s224_s23 + $0x8] sm:$0xff] %v490_v53  ;;  %v500_v32 = vmul.f32 %v486_v55, %v1133_v38  ;;  %v501_v35 = vmul.f32 %v486_v55, %v1147_v48  ;;  %v502_v41 = vmul.f32 %v486_v55, %v1171_v3 }
 0x196   : > { %505 = vst [vmem:[%s224_s23 + $0x10] sm:$0xff] %v491_v54 }
 0x197   : > { %506 = vst [vmem:[%s224_s23 + $0x18] sm:$0xff] %v492_v56 }
 0x198   : > { %507 = vst [vmem:[%s224_s23 + $0x20] sm:$0xff] %v493_v57 }
 0x199   : > { %508 = vst [vmem:[%s224_s23 + $0x28] sm:$0xff] %v494_v58 }
 0x19a   : > { %509 = vst [vmem:[%s224_s23 + $0x30] sm:$0xff] %v495_v59 }
 0x19b   : > { %510 = vst [vmem:[%s224_s23 + $0x38] sm:$0xff] %v496_v24 }
 0x19c   : > { %511 = vst [vmem:[%s224_s23 + $0x40] sm:$0xff] %v497_v31 }
 0x19d   : > { %512 = vst [vmem:[%s224_s23 + $0x48] sm:$0xff] %v498_v25 }
 0x19e   : > { %513 = vst [vmem:[%s224_s23 + $0x50] sm:$0xff] %v499_v40 }
 0x19f   : > { %514 = vst [vmem:[%s224_s23 + $0x58] sm:$0xff] %v500_v32 }
 0x1a0   : > { %515 = vst [vmem:[%s224_s23 + $0x60] sm:$0xff] %v501_v35 }
 0x1a1   : > { %516 = vst [vmem:[%s224_s23 + $0x68] sm:$0xff] %v502_v41 }
 0x1a2   : > { %924 = shalt.err (!%p921_p10)
}
 0x1a3   : > { %s976_s29 = smov 128   ;;  %s977_s27 = smov 8  }
 0x1a4   : > { %739 = dma.vmem_to_hbm [thread:$0]  (%p1070_p5), %s532_s16, 1792, %s534_s6, %s518_s7, %s976_s29, %s976_s29, %s977_s27  }
 0x1a5 PF: > { %s548_s28 = sand.u32 1, %s955_s12   ;;  %p1236_p12 = scmp.ge.s32.totalorder %s967_s15, 2 }
 0x1a6   : > { %s549_s18 = scalar_lea.sflag [#allocation4], %s548_s28 }
 0x1a7   : > { %p753_p13 = pnand %p1236_p12, %p1033_p6 }
 0x1a9   : > { %p754_p0 = pneg %p753_p13 }
 0x1ab   : > { %950 = dma.done.wait (%p754_p0), %s549_s18, 1792  }
 0x1ac   : > { %952 = vsyncadd (%p754_p0), %s549_s18, 4294965504  ;;  %p17_p3 = scmp.ge.s32.totalorder %s1057_s8, 4   ;;  %s1237_s12 = smov %s959_s13 }
 0x1ad   : > { %s1238_s13 = smov %s963_s14  ;;  %s1239_s14 = smov %s1066_s11 }
 0x1ae   : > { %s1240_s15 = smov %s1057_s8  ;;  %19 = sbr.rel (!%p17_p3) target bundleno = 6 (0x6), region = 85 }
 0x1b3   :  { %555 = vsyncpa [#allocation3], 1 }
 0x1b4   :  { %557 = vsyncpa [#allocation3 + $0x1], 1 }
 0x1b5   :  { %558 = vsyncpa [#allocation6], 1 }
 0x1b6   :  { %559 = vsyncpa [#allocation4], 1 }
 0x1b7   :  { %561 = vsyncpa [#allocation4 + $0x1], 1 }

</bundles_post_ra>
